<compile_context>
chip_gen: v7x
topology: tpu7x:2x2x1
jax: 0.10.0
libtpu: 0.0.40
codegen_flags: <defaults>
</compile_context>

<pallas_src>
import functools

import jax
import jax.numpy as jnp
import numpy as np
from jax import lax
from jax.experimental import pallas as pl
from jax.experimental.pallas import tpu as pltpu

H = W = 16
CIN, COUT = 3, 64
KH = KW = 3
PH, PW = H // 2, W // 2          # 8, 8   pooled spatial
NPIX = H * W                     # 256    conv-output pixels / image
NPOOL = PH * PW                  # 64     pooled pixels / image
KDIM = KH * KW * CIN             # 27     im2col contraction
KPAD = 32                        # padded K: col 27 = 1.0 (bias), cols 28..31 = 0


def _as_i32(v):
    v &= 0xFFFFFFFF
    return np.int32(v - (1 << 32) if v >= (1 << 31) else v)


_MIX1 = _as_i32(0x85EBCA6B)
_MIX2 = _as_i32(0xC2B2AE35)


def _fmix32(x):
    """murmur3 finalizer on int32 (wrapping mul, logical shifts) — pure VPU ops."""
    x = x ^ lax.shift_right_logical(x, jnp.int32(16))
    x = x * _MIX1
    x = x ^ lax.shift_right_logical(x, jnp.int32(13))
    x = x * _MIX2
    x = x ^ lax.shift_right_logical(x, jnp.int32(16))
    return x


def _cnn_kernel(seed_ref, patches_ref, w_ref, out_ref, *, training, bsz):
    # conv1 (+bias via the folded ones-column) as ONE MXU matmul per grid step:
    # (64, 32) @ (32, B*256) -> (64, B*256), f32 accumulation.  Both the
    # streamed operand and the result are lane-dense (minor dim >= 128).
    acc = jnp.dot(w_ref[...], patches_ref[...], preferred_element_type=jnp.float32)
    acc = jnp.maximum(acc, 0.0)                       # ReLU
    bn = bsz * NPOOL
    # MaxPool 2x2 / stride 2: columns are ordered (window-pixel k, image, pooled
    # pixel), so the pool is a max over 4 contiguous, vreg-aligned lane slices.
    pooled = jnp.maximum(
        jnp.maximum(acc[:, 0 * bn:1 * bn], acc[:, 1 * bn:2 * bn]),
        jnp.maximum(acc[:, 2 * bn:3 * bn], acc[:, 3 * bn:4 * bn]))   # (64, B*64)

    if training:
        # Dropout(p=0.5), training mode: drop w.p. 0.5.  The 1/(1-p)=2x rescale
        # is pre-folded into the conv weights/bias in the wrapper (exact:
        # power-of-two scaling commutes with bf16 rounding, ReLU and max).
        # TODO(synk): cannot reproduce torch's RNG stream bit-for-bit; uses a
        # counter-based hash of a globally-unique element id instead.
        g = pl.program_id(0)
        col = lax.broadcasted_iota(jnp.int32, (COUT, bn), 1)
        row = lax.broadcasted_iota(jnp.int32, (COUT, bn), 0)
        elem_id = seed_ref[0] + (g * jnp.int32(bn) + col) * jnp.int32(COUT) + row
        keep = (_fmix32(elem_id) & jnp.int32(1)) == 0
        pooled = jnp.where(keep, pooled, 0.0)

    out_ref[...] = pooled.astype(out_ref.dtype)


def cnn_with_dropout_forward(x_nchw, conv_w, conv_b, seed=0, *,
                             training=True, images_per_block=None,
                             out_dtype=jnp.bfloat16):
    """x_nchw: (N,3,16,16); conv_w: (64,3,3,3); conv_b: (64,) -> NCHW (N,64,8,8)."""
    N = x_nchw.shape[0]
    assert x_nchw.shape == (N, CIN, H, W)

    # Block sizing: >=2 grid blocks when possible (v7x megacore split), <=64
    # images/block (per-step footprint ~9 MiB), even B when there is more than
    # one block so the output block stays a multiple of 128 lanes.
    if images_per_block is None:
        B = max(1, min(64, -(-N // 2)))
    else:
        B = max(1, min(int(images_per_block), N))
    nblocks = -(-N // B)
    if nblocks > 1 and (B * NPOOL) % 128:
        B += 1                                       # keep the out block lane-aligned
        nblocks = -(-N // B)
    npad = nblocks * B

    # ---- JAX glue: im2col in bf16 (cast early: halves glue HBM traffic) ----
    x = jnp.transpose(x_nchw, (0, 2, 3, 1)).astype(jnp.bfloat16)      # NHWC
    x_pad = jnp.pad(x, ((0, 0), (1, 1), (1, 1), (0, 0)))              # padding=1
    cols = jnp.stack(
        [x_pad[:, dh:dh + H, dw:dw + W, :] for dh in range(KH) for dw in range(KW)],
        axis=3).reshape(N, H, W, KDIM)                                # (kh, kw, ci)
    # Group conv-output pixels by their 2x2 pooling-window position k = 0..3.
    blocks = [cols[:, 0::2, 0::2, :], cols[:, 0::2, 1::2, :],
              cols[:, 1::2, 0::2, :], cols[:, 1::2, 1::2, :]]
    pat = jnp.stack([b.reshape(N, NPOOL, KDIM) for b in blocks], axis=1)  # (N,4,64,27)
    # Pad K 27 -> 32: column 27 is all-ones so the conv bias rides the matmul.
    pat = jnp.concatenate(
        [pat,
         jnp.ones((N, 4, NPOOL, 1), jnp.bfloat16),
         jnp.zeros((N, 4, NPOOL, KPAD - KDIM - 1), jnp.bfloat16)], axis=-1)
    if npad != N:
        pat = jnp.pad(pat, ((0, npad - N), (0, 0), (0, 0), (0, 0)))
    # Transposed, lane-dense kernel layout: (KPAD, npad*256) with column order
    # (block, window-pixel k, image-in-block, pooled pixel); each grid step
    # DMAs a (32, B*256) block whose minor dim is a multiple of 128 lanes.
    pat = pat.reshape(nblocks, B, 4, NPOOL, KPAD)
    patches_t = jnp.transpose(pat, (4, 0, 2, 1, 3)).reshape(KPAD, npad * NPIX)

    # Conv weight (Cout,Cin,kh,kw) -> (Cout, kh*kw*Cin) = (64,27); col 27 = bias.
    # Dropout's 1/(1-p)=2x rescale is folded in here when training.
    scale = 2.0 if training else 1.0
    w_t = jnp.transpose(conv_w.astype(jnp.float32), (0, 2, 3, 1)).reshape(COUT, KDIM)
    w_t = jnp.concatenate(
        [w_t, conv_b.astype(jnp.float32).reshape(COUT, 1),
         jnp.zeros((COUT, KPAD - KDIM - 1), jnp.float32)], axis=1)
    w_t = (scale * w_t).astype(jnp.bfloat16)                          # (64, 32)

    seed_arr = jnp.asarray([seed], dtype=jnp.int32)

    # Rough per-step VMEM footprint; raise the scoped-VMEM limit only for big
    # blocks, capped at 56 MiB to respect v7x's 64 MiB physical VMEM per core.
    vmem_est = (2 * KPAD * B * NPIX * 2        # patch double buffer (bf16)
                + 2 * COUT * B * NPOOL * 2     # output double buffer (bf16)
                + COUT * B * NPIX * 4          # f32 pre-pool activation
                + (2 << 20))                   # headroom
    vmem_limit = int(min(max(vmem_est, 32 << 20), 56 << 20))

    kernel = functools.partial(_cnn_kernel, training=training, bsz=B)
    out = pl.pallas_call(
        kernel,
        out_shape=jax.ShapeDtypeStruct((COUT, npad * NPOOL), out_dtype),
        grid_spec=pltpu.PrefetchScalarGridSpec(
            num_scalar_prefetch=1,                       # dropout seed (SMEM)
            grid=(nblocks,),
            in_specs=[
                pl.BlockSpec((KPAD, B * NPIX), lambda g, seed: (0, g)),
                pl.BlockSpec((COUT, KPAD), lambda g, seed: (0, 0)),
            ],
            out_specs=pl.BlockSpec((COUT, B * NPOOL), lambda g, seed: (0, g)),
        ),
        compiler_params=pltpu.CompilerParams(
            # batch blocks are independent -> shard across v7x's two TensorCores
            dimension_semantics=("parallel",),
            vmem_limit_bytes=vmem_limit),
    )(seed_arr, patches_t, w_t)

    # (64 channels, N*64 pooled pixels) -> NCHW (N, 64, 8, 8) for torch parity.
    out = out[:, :N * NPOOL].reshape(COUT, N, PH, PW)
    return jnp.transpose(out, (1, 0, 2, 3))


def _reference_no_dropout(x_nchw, conv_w, conv_b, *, cast_bf16=False):
    """Pure-JAX reference for conv+relu+maxpool (dropout disabled)."""
    x = jnp.transpose(x_nchw, (0, 2, 3, 1)).astype(jnp.float32)
    w_hwio = jnp.transpose(conv_w.astype(jnp.float32), (2, 3, 1, 0))
    b = conv_b.astype(jnp.float32)
    if cast_bf16:   # match the kernel's bf16-input / f32-accumulate numerics
        x = x.astype(jnp.bfloat16)
        w_hwio = w_hwio.astype(jnp.bfloat16)
        b = b.astype(jnp.bfloat16).astype(jnp.float32)
    y = jax.lax.conv_general_dilated(
        x, w_hwio, window_strides=(1, 1), padding="SAME",
        dimension_numbers=("NHWC", "HWIO", "NHWC"),
        preferred_element_type=jnp.float32)
    y = jnp.maximum(y + b, 0.0)
    y = jax.lax.reduce_window(y, -jnp.inf, jax.lax.max,
                              (1, 2, 2, 1), (1, 2, 2, 1), "VALID")
    return jnp.transpose(y, (0, 3, 1, 2))


if __name__ == "__main__":
    key = jax.random.PRNGKey(0)
    kx, kw, kb, kw1, kb1, kw2, kb2, kx2 = jax.random.split(key, 8)

    N = 2
    x = jax.random.normal(kx, (N, CIN, H, W), dtype=jnp.float32)

    # conv1: Conv2d(3, 64, kernel_size=3, padding=1) — PyTorch-style U(-b, b) init.
    fan_in = CIN * KH * KW
    bound = 1.0 / float(np.sqrt(fan_in))
    conv_w = jax.random.uniform(kw, (COUT, CIN, KH, KW), minval=-bound, maxval=bound,
                                dtype=jnp.float32)
    conv_b = jax.random.uniform(kb, (COUT,), minval=-bound, maxval=bound,
                                dtype=jnp.float32)

    # fc1 / fc2 / flatten: declared in __init__ but unused in forward(); shape
    # fidelity only.
    b1 = 1.0 / float(np.sqrt(COUT * PH * PW))
    fc1_w = jax.random.uniform(kw1, (512, COUT * PH * PW), minval=-b1, maxval=b1,
                               dtype=jnp.float32)
    fc1_b = jax.random.uniform(kb1, (512,), minval=-b1, maxval=b1, dtype=jnp.float32)
    b2 = 1.0 / float(np.sqrt(512))
    fc2_w = jax.random.uniform(kw2, (10, 512), minval=-b2, maxval=b2, dtype=jnp.float32)
    fc2_b = jax.random.uniform(kb2, (10,), minval=-b2, maxval=b2, dtype=jnp.float32)

    # ---- Correctness: deterministic path (eval mode == dropout off) ----
    out_eval = cnn_with_dropout_forward(x, conv_w, conv_b, seed=0, training=False)
    jax.block_until_ready(out_eval)
    assert out_eval.shape == (N, COUT, PH, PW)
    oe = np.asarray(out_eval.astype(jnp.float32))
    # Check vs a bf16-matched reference (same input quantization; bf16 output).
    ref_bf16 = np.asarray(_reference_no_dropout(x, conv_w, conv_b, cast_bf16=True))
    np.testing.assert_allclose(oe, ref_bf16, rtol=1e-2, atol=1e-2)
    # Looser check vs the full-f32 reference (documents bf16 quantization).
    ref_f32 = np.asarray(_reference_no_dropout(x, conv_w, conv_b))
    np.testing.assert_allclose(oe, ref_f32, rtol=5e-2, atol=3e-2)

    # ---- Multi-block grid path (N=6: default -> 2 blocks, forced -> 3 blocks,
    #      exercises batch padding as well) ----
    x6 = jax.random.normal(kx2, (6, CIN, H, W), dtype=jnp.float32)
    o6_a = cnn_with_dropout_forward(x6, conv_w, conv_b, training=False)
    o6_b = cnn_with_dropout_forward(x6, conv_w, conv_b, training=False,
                                    images_per_block=2)
    a6 = np.asarray(o6_a.astype(jnp.float32))
    b6 = np.asarray(o6_b.astype(jnp.float32))
    np.testing.assert_allclose(a6, b6, rtol=1e-2, atol=1e-2)
    ref6 = np.asarray(_reference_no_dropout(x6, conv_w, conv_b, cast_bf16=True))
    np.testing.assert_allclose(a6, ref6, rtol=1e-2, atol=1e-2)

    # ---- Training mode (in-kernel dropout), as in the fresh module ----
    out_train = cnn_with_dropout_forward(x, conv_w, conv_b, seed=12345, training=True)
    jax.block_until_ready(out_train)
    assert out_train.shape == (N, COUT, PH, PW)
    ot = np.asarray(out_train.astype(jnp.float32))
    pos = oe > 1e-6                       # elements that are nonzero pre-dropout
    kept = ot[pos] != 0.0
    keep_rate = float(kept.mean())
    assert 0.35 < keep_rate < 0.65, f"dropout keep rate off: {keep_rate}"
    # Kept values must be exactly 2x the eval values (scale 1/(1-p)=2, folded
    # into the weights; power-of-two scaling is exact through bf16/ReLU/max).
    np.testing.assert_allclose(ot[pos][kept], 2.0 * oe[pos][kept],
                               rtol=1e-5, atol=1e-6)

    print("KERNEL_OK")
</pallas_src>

<mosaic_0001>
module attributes {stable_mosaic.version = 11 : i64} {
  func.func @_cnn_kernel(%arg0: i32, %arg1: memref<1xi32, #tpu.memory_space<smem>>, %arg2: memref<32x512xbf16, #tpu.memory_space<vmem>>, %arg3: memref<64x32xbf16, #tpu.memory_space<vmem>>, %arg4: memref<64x128xbf16, #tpu.memory_space<vmem>>) attributes {dimension_semantics = [#tpu.dimension_semantics<parallel>], iteration_bounds = array<i64: 1>, scalar_prefetch = 1 : i64, scratch_operands = 0 : i64, tpu.core_type = #tpu.core_type<tc>, window_params = [{transform_indices = @transform_0, window_bounds = array<i64: 32, 512>}, {pipeline_mode = #tpu.pipeline_mode<synchronous>, transform_indices = @transform_1, window_bounds = array<i64: 64, 32>}, {transform_indices = @transform_2, window_bounds = array<i64: 64, 128>}]} {
    %c0 = arith.constant 0 : index
    %c0_0 = arith.constant 0 : index
    %0 = vector.load %arg3[%c0, %c0_0] : memref<64x32xbf16, #tpu.memory_space<vmem>>, vector<64x32xbf16>
    %c0_1 = arith.constant 0 : index
    %c0_2 = arith.constant 0 : index
    %1 = vector.load %arg2[%c0_1, %c0_2] : memref<32x512xbf16, #tpu.memory_space<vmem>>, vector<32x512xbf16>
    %cst = arith.constant dense<0.000000e+00> : vector<64x512xf32>
    %2 = tpu.matmul %0, %1, %cst {dimension_numbers = #tpu.dot_dimension_numbers<[1], [0], [0], [1], [0, 0, 1, 1], [], []>} : vector<64x32xbf16>, vector<32x512xbf16>, vector<64x512xf32> -> vector<64x512xf32>
    %cst_3 = arith.constant 0.000000e+00 : f32
    %3 = vector.broadcast %cst_3 : f32 to vector<64x512xf32>
    %4 = arith.maximumf %2, %3 : vector<64x512xf32>
    %5 = vector.extract_strided_slice %4 {offsets = [0, 0], sizes = [64, 128], strides = [1, 1]} : vector<64x512xf32> to vector<64x128xf32>
    %6 = vector.extract_strided_slice %4 {offsets = [0, 128], sizes = [64, 128], strides = [1, 1]} : vector<64x512xf32> to vector<64x128xf32>
    %7 = arith.maximumf %5, %6 : vector<64x128xf32>
    %8 = vector.extract_strided_slice %4 {offsets = [0, 256], sizes = [64, 128], strides = [1, 1]} : vector<64x512xf32> to vector<64x128xf32>
    %9 = vector.extract_strided_slice %4 {offsets = [0, 384], sizes = [64, 128], strides = [1, 1]} : vector<64x512xf32> to vector<64x128xf32>
    %10 = arith.maximumf %8, %9 : vector<64x128xf32>
    %11 = arith.maximumf %7, %10 : vector<64x128xf32>
    %12 = arith.truncf %11 : vector<64x128xf32> to vector<64x128xbf16>
    %c0_4 = arith.constant 0 : index
    %c0_5 = arith.constant 0 : index
    %13 = vector.load %arg4[%c0_4, %c0_5] : memref<64x128xbf16, #tpu.memory_space<vmem>>, vector<64x128xbf16>
    tpu.vector_store %arg4[%c0_4, %c0_5], %12 {strides = array<i32>} : memref<64x128xbf16, #tpu.memory_space<vmem>>, vector<64x128xbf16>,
    return
  }
  func.func @transform_0(%arg0: i32, %arg1: memref<1xi32, #tpu.memory_space<smem>>) -> (i32, i32) {
    %c0_i32 = arith.constant 0 : i32
    %c0_i32_0 = arith.constant 0 : i32
    return %c0_i32, %arg0 : i32, i32
  }
  func.func @transform_1(%arg0: i32, %arg1: memref<1xi32, #tpu.memory_space<smem>>) -> (i32, i32) {
    %c0_i32 = arith.constant 0 : i32
    %c0_i32_0 = arith.constant 0 : i32
    %c0_i32_1 = arith.constant 0 : i32
    return %c0_i32, %c0_i32_0 : i32, i32
  }
  func.func @transform_2(%arg0: i32, %arg1: memref<1xi32, #tpu.memory_space<smem>>) -> (i32, i32) {
    %c0_i32 = arith.constant 0 : i32
    %c0_i32_0 = arith.constant 0 : i32
    return %c0_i32, %arg0 : i32, i32
  }
}

</mosaic_0001>

<bundles_post_ra>
// kernel: tpu_custom_call.1
= control target key start
LH: loop header
LB: loop body
LE: loop exit
PB: predicated region body
PF: predicated region fallthrough
CT: control target
= control target key end

     0   :  { %9 = vsyncpa [#allocation5], 0  ;;  %s578_s0 = inlined_call_operand.<no memory space> [shape: s32[1], index: 0, kind: input, shape index: {}]   ;;  %s579_s1 = inlined_call_operand.hbm [shape: bf16[32,512], index: 1, kind: input, shape index: {}]   ;;  %s580_s2 = inlined_call_operand.vmem [shape: bf16[64,32], index: 2, kind: input, shape index: {}]   ;;  %s581_s3 = inlined_call_operand.hbm [shape: bf16[64,128], index: 3, kind: output, shape index: {}]  }
   0x1   :  { %10 = vsyncpa [#allocation6], 0  ;;  %s507_s12 = smov [#allocation4]   ;;  %s459_s16 = scalar_lea.hbm %s579_s1, 1024 }
   0x2   :  { %s16_s13 = sshll.u32 %s507_s12, 4  ;;  %p460_p0 = scmp.ne.s32.totalorder %s579_s1, %s459_s16  ;;  %s17_s13 = int_to_ptr.vmem [resolvable:$true] %s16_s13 }
   0x3   :  { %p463_p1 = scmp.lt.u32.totalorder %s459_s16, %s579_s1 }
   0x5   :  { %p465_p2 = pnand %p463_p1, %p460_p0 }
   0x7   :  { %468 = shalt.err (!%p465_p2)
}
   0x8   :  { %s469_s20 = scalar_lea.vmem %s17_s13, 1024  ;;  %p474_p4 = scmp.lt.s32.totalorder %s17_s13, %s17_s13 }
   0x9   :  { %p470_p3 = scmp.ne.s32.totalorder %s17_s13, %s469_s20  ;;  %p475_p5 = scmp.lt.s32.totalorder %s469_s20, %s469_s20 }
   0xb   :  { %p476_p6 = por %p475_p5, %p474_p4 }
   0xd   :  { %p477_p7 = pnand %p476_p6, %p470_p3 }
   0xf   :  { %480 = shalt.err (!%p477_p7)
}
  0x10   :  { %s508_s21 = smov 256   ;;  %s509_s22 = smov 16  }
  0x11   :  { %22 = dma.hbm_to_vmem [thread:$0]  %s579_s1, 1024, %s17_s13, [#allocation5], %s508_s21, %s508_s21, %s509_s22  }
  0x12   :  { %503 = dma.done.wait [#allocation5], 1024  }
  0x13   :  { %504 = vsyncadd [#allocation5], 4294966272  ;;  %v510_v0 = vmov 0   ;;  %v443_v1 = vld [vmem:[#allocation4 + $0x4] ss:$16 sps:$4 sm:$0xff]   ;;  %vm105_vm0 = vcmask 261120  }
  0x14   :  { %150 = vmatprep.mubr.bf16.mxu0 %v510_v0  ;;  %223 = vmatprep.mubr.bf16.mxu1 %v510_v0  ;;  %v445_v2 = vld [vmem:[#allocation4 + $0xc] ss:$16 sps:$4 sm:$0xff]   ;;  %v447_v3 = vld [vmem:[#allocation4] ss:$16 sps:$4 sm:$0xff]   ;;  %v448_v4 = vld [vmem:[#allocation4 + $0x8] ss:$16 sps:$4 sm:$0xff]  }
  0x15   :  { %118 = vmatprep.subr.bf16.mxu0 %v443_v1  ;;  %191 = vmatprep.subr.bf16.mxu1 %v445_v2  ;;  %v449_v5 = vld [vmem:[#allocation4 + $0x24] ss:$16 sps:$4 sm:$0xff]   ;;  %v451_v6 = vld [vmem:[#allocation4 + $0x2c] ss:$16 sps:$4 sm:$0xff]   ;;  %v453_v7 = vld [vmem:[#allocation4 + $0x20] ss:$16 sps:$4 sm:$0xff]  }
  0x16   :  { %119 = vmatpush1.bf16.msra.mxu0 %v447_v3  ;;  %192 = vmatpush1.bf16.msra.mxu1 %v448_v4  ;;  %v454_v8 = vld [vmem:[#allocation4 + $0x28] ss:$16 sps:$4 sm:$0xff]   ;;  %v455_v9 = vld [vmem:[%s580_s2] sm:$0xff]   ;;  %v457_v11 = vld [vmem:[%s580_s2 + $0x10] sm:$0xff]  }
  0x17   :  { %120 = vmatprep.subr.bf16.mxu0 %v449_v5  ;;  %193 = vmatprep.subr.bf16.mxu1 %v451_v6  ;;  %v456_v10 = vld [vmem:[%s580_s2 + $0x8] sm:$0xff]   ;;  %v458_v12 = vld [vmem:[%s580_s2 + $0x18] sm:$0xff]   ;;  %s511_s2 = smov [#allocation7]  }
  0x18   :  { %s365_s5 = sshll.u32 %s511_s2, 4  ;;  %s366_s5 = int_to_ptr.vmem [resolvable:$true] %s365_s5 }
  0x19   :  { %s481_s6 = scalar_lea.vmem %s366_s5, 512  ;;  %p486_p9 = scmp.lt.s32.totalorder %s366_s5, %s366_s5 }
  0x1a   :  { %121 = vmatpush1.bf16.msra.mxu0 %v453_v7  ;;  %194 = vmatpush1.bf16.msra.mxu1 %v454_v8  ;;  %p482_p8 = scmp.ne.s32.totalorder %s366_s5, %s481_s6  ;;  %p487_p10 = scmp.lt.s32.totalorder %s481_s6, %s481_s6 }
  0x1c   :  { %p488_p11 = por %p487_p10, %p486_p9 }
  0x1d   :  { %389 = vmatmul.mubr.msk.bf16.vlgmr.msra.gmra.mrb[0].mxu0 %vm105_vm0, %v455_v9  ;;  %393 = vmatmul.mubr.msk.bf16.vlgmr.msra.gmra.mrb[0].mxu1 %vm105_vm0, %v455_v9 }
  0x1e   :  { %160 = vmatprep.mubr.bf16.mxu0 %v510_v0  ;;  %233 = vmatprep.mubr.bf16.mxu1 %v510_v0  ;;  %p489_p12 = pnand %p488_p11, %p482_p8 }
  0x25   :  { %390 = vmatmul.mubr.msk.bf16.gmra.mrb[4].mxu0 %vm105_vm0, %v456_v10  ;;  %394 = vmatmul.mubr.msk.bf16.gmra.mrb[4].mxu1 %vm105_vm0, %v456_v10 }
  0x26   :  { %170 = vmatprep.mubr.bf16.mxu0 %v510_v0  ;;  %243 = vmatprep.mubr.bf16.mxu1 %v510_v0 }
  0x2d   :  { %391 = vmatmul.mubr.msk.bf16.gmra.mrb[8].mxu0 %vm105_vm0, %v457_v11  ;;  %395 = vmatmul.mubr.msk.bf16.gmra.mrb[8].mxu1 %vm105_vm0, %v457_v11 }
  0x2e   :  { %180 = vmatprep.mubr.bf16.mxu0 %v510_v0  ;;  %253 = vmatprep.mubr.bf16.mxu1 %v510_v0 }
  0x35   :  { %392 = vmatmul.mubr.msk.bf16.gmra.mrb[12].mxu0 %vm105_vm0, %v458_v12  ;;  %396 = vmatmul.mubr.msk.bf16.gmra.mrb[12].mxu1 %vm105_vm0, %v458_v12 }
  0xf0   :  { %v152_v13 = vpop.f32.mrb[0].mxu0  ;;  %v225_v14 = vpop.f32.mrb[0].mxu1 }
  0xf1   :  { %v264_v15 = vmax.f32 %v152_v13, 0.0  ;;  %v266_v16 = vmax.f32 %v225_v14, 0.0  ;;  %v154_v17 = vpop.f32.mrb[1].mxu0  ;;  %v227_v18 = vpop.f32.mrb[1].mxu1 }
  0xf2   :  { %v265_v19 = vmax.f32 %v154_v17, 0.0  ;;  %v267_v20 = vmax.f32 %v227_v18, 0.0  ;;  %v156_v21 = vpop.f32.mrb[2].mxu0  ;;  %v229_v22 = vpop.f32.mrb[2].mxu1 }
  0xf3   :  { %v268_v23 = vmax.f32 %v156_v21, 0.0  ;;  %v270_v24 = vmax.f32 %v229_v22, 0.0  ;;  %v158_v25 = vpop.f32.mrb[3].mxu0  ;;  %v231_v26 = vpop.f32.mrb[3].mxu1 }
  0xf4   :  { %v296_v27 = vmax.f32 %v264_v15, %v265_v19  ;;  %v304_v28 = vmax.f32 %v266_v16, %v267_v20  ;;  %v269_v29 = vmax.f32 %v158_v25, 0.0  ;;  %v271_v30 = vmax.f32 %v231_v26, 0.0 }
  0xf6   :  { %v312_v31 = vmax.f32 %v296_v27, %v304_v28  ;;  %v297_v32 = vmax.f32 %v268_v23, %v269_v29  ;;  %v305_v33 = vmax.f32 %v270_v24, %v271_v30 }
  0xf8   :  { %v313_v34 = vmax.f32 %v297_v32, %v305_v33  ;;  %v162_v35 = vpop.f32.mrb[4].mxu0  ;;  %v235_v36 = vpop.f32.mrb[4].mxu1 }
  0xf9   :  { %v272_v37 = vmax.f32 %v162_v35, 0.0  ;;  %v274_v38 = vmax.f32 %v235_v36, 0.0  ;;  %v164_v39 = vpop.f32.mrb[5].mxu0  ;;  %v237_v40 = vpop.f32.mrb[5].mxu1 }
  0xfa   :  { %v416_v41 = vpack.c.bf16 %v313_v34, %v312_v31  ;;  %v273_v42 = vmax.f32 %v164_v39, 0.0  ;;  %v275_v43 = vmax.f32 %v237_v40, 0.0  ;;  %v166_v44 = vpop.f32.mrb[6].mxu0  ;;  %v239_v45 = vpop.f32.mrb[6].mxu1 }
  0xfb   :  { %v276_v46 = vmax.f32 %v166_v44, 0.0  ;;  %v278_v47 = vmax.f32 %v239_v45, 0.0  ;;  %v168_v48 = vpop.f32.mrb[7].mxu0  ;;  %v241_v49 = vpop.f32.mrb[7].mxu1 }
  0xfc   :  { %417 = vst [vmem:[#allocation7] sm:$0xff] %v416_v41   ;;  %v298_v50 = vmax.f32 %v272_v37, %v273_v42  ;;  %v306_v51 = vmax.f32 %v274_v38, %v275_v43  ;;  %v277_v52 = vmax.f32 %v168_v48, 0.0  ;;  %v279_v53 = vmax.f32 %v241_v49, 0.0 }
  0xfe   :  { %v314_v54 = vmax.f32 %v298_v50, %v306_v51  ;;  %v299_v55 = vmax.f32 %v276_v46, %v277_v52  ;;  %v307_v56 = vmax.f32 %v278_v47, %v279_v53 }
 0x100   :  { %v315_v57 = vmax.f32 %v299_v55, %v307_v56  ;;  %v172_v58 = vpop.f32.mrb[8].mxu0  ;;  %v245_v59 = vpop.f32.mrb[8].mxu1 }
 0x101   :  { %v280_v60 = vmax.f32 %v172_v58, 0.0  ;;  %v282_v61 = vmax.f32 %v245_v59, 0.0  ;;  %v174_v62 = vpop.f32.mrb[9].mxu0  ;;  %v247_v63 = vpop.f32.mrb[9].mxu1 }
 0x102   :  { %v421_v0 = vpack.c.bf16 %v315_v57, %v314_v54  ;;  %v281_v1 = vmax.f32 %v174_v62, 0.0  ;;  %v283_v2 = vmax.f32 %v247_v63, 0.0  ;;  %v176_v3 = vpop.f32.mrb[10].mxu0  ;;  %v249_v4 = vpop.f32.mrb[10].mxu1 }
 0x103   :  { %v284_v5 = vmax.f32 %v176_v3, 0.0  ;;  %v286_v6 = vmax.f32 %v249_v4, 0.0  ;;  %v178_v7 = vpop.f32.mrb[11].mxu0  ;;  %v251_v8 = vpop.f32.mrb[11].mxu1 }
 0x104   :  { %433 = vst [vmem:[#allocation7 + $0x8] sm:$0xff] %v421_v0   ;;  %v300_v9 = vmax.f32 %v280_v60, %v281_v1  ;;  %v308_v10 = vmax.f32 %v282_v61, %v283_v2  ;;  %v285_v11 = vmax.f32 %v178_v7, 0.0  ;;  %v287_v12 = vmax.f32 %v251_v8, 0.0 }
 0x106   :  { %v316_v13 = vmax.f32 %v300_v9, %v308_v10  ;;  %v301_v14 = vmax.f32 %v284_v5, %v285_v11  ;;  %v309_v15 = vmax.f32 %v286_v6, %v287_v12 }
 0x108   :  { %v317_v16 = vmax.f32 %v301_v14, %v309_v15  ;;  %v182_v17 = vpop.f32.mrb[12].mxu0  ;;  %v255_v18 = vpop.f32.mrb[12].mxu1 }
 0x109   :  { %v288_v19 = vmax.f32 %v182_v17, 0.0  ;;  %v290_v20 = vmax.f32 %v255_v18, 0.0  ;;  %v184_v21 = vpop.f32.mrb[13].mxu0  ;;  %v257_v22 = vpop.f32.mrb[13].mxu1 }
 0x10a   :  { %v426_v23 = vpack.c.bf16 %v317_v16, %v316_v13  ;;  %v289_v24 = vmax.f32 %v184_v21, 0.0  ;;  %v291_v25 = vmax.f32 %v257_v22, 0.0  ;;  %v186_v26 = vpop.f32.mrb[14].mxu0  ;;  %v259_v27 = vpop.f32.mrb[14].mxu1 }
 0x10b   :  { %v292_v28 = vmax.f32 %v186_v26, 0.0  ;;  %v294_v29 = vmax.f32 %v259_v27, 0.0  ;;  %v188_v30 = vpop.f32.mrb[15].mxu0  ;;  %v261_v31 = vpop.f32.mrb[15].mxu1 }
 0x10c   :  { %434 = vst [vmem:[#allocation7 + $0x10] sm:$0xff] %v426_v23   ;;  %v302_v32 = vmax.f32 %v288_v19, %v289_v24  ;;  %v310_v33 = vmax.f32 %v290_v20, %v291_v25  ;;  %v293_v34 = vmax.f32 %v188_v30, 0.0  ;;  %v295_v35 = vmax.f32 %v261_v31, 0.0 }
 0x10e   :  { %v318_v36 = vmax.f32 %v302_v32, %v310_v33  ;;  %v303_v37 = vmax.f32 %v292_v28, %v293_v34  ;;  %v311_v38 = vmax.f32 %v294_v29, %v295_v35 }
 0x110   :  { %v319_v39 = vmax.f32 %v303_v37, %v311_v38 }
 0x112   :  { %v431_v40 = vpack.c.bf16 %v319_v39, %v318_v36 }
 0x114   :  { %435 = vst [vmem:[#allocation7 + $0x18] sm:$0xff] %v431_v40  }
 0x115   :  { %492 = shalt.err (!%p489_p12)
}
 0x116   :  { %s493_s9 = scalar_lea.hbm %s581_s3, 512 }
 0x117   :  { %p494_p13 = scmp.ne.s32.totalorder %s581_s3, %s493_s9  ;;  %p497_p0 = scmp.lt.u32.totalorder %s493_s9, %s581_s3 }
 0x119   :  { %p499_p1 = pnand %p497_p0, %p494_p13 }
 0x11b   :  { %502 = shalt.err (!%p499_p1)
}
 0x11c   :  { %s512_s14 = smov 64   ;;  %s513_s15 = smov 4  }
 0x11d   :  { %371 = dma.vmem_to_hbm [thread:$0]  %s366_s5, 512, %s581_s3, [#allocation6], %s512_s14, %s512_s14, %s513_s15  }
 0x11e   :  { %505 = dma.done.wait [#allocation6], 512  }
 0x11f   :  { %506 = vsyncadd [#allocation6], 4294966784 }
 0x120   :  { %375 = vsyncpa [#allocation5], 1 }
 0x121   :  { %376 = vsyncpa [#allocation6], 1 }

</bundles_post_ra>
